<compile_context>
chip_gen: v7x
topology: tpu7x:2x2x1
jax: 0.10.0
libtpu: 0.0.40
codegen_flags: <defaults>
</compile_context>

<pallas_src>
import functools

import jax
import jax.numpy as jnp
from jax.experimental import pallas as pl
from jax.experimental.pallas import tpu as pltpu


def _round_up(x, m):
    return ((x + m - 1) // m) * m


# ----------------------------- Pallas kernel ------------------------------- #

def _mlp_fused_kernel(*refs, n_layers):
    """Fused MLP over one batch tile.

    refs = (x_ref, w0, b0, w1, b1, ..., wN, bN, o_ref)
      x_ref : [D, TB]      f32   (batch along lanes)
      w_i   : [out, in]    bf16  (PyTorch [out, in] layout, VMEM resident)
      b_i   : [out, 1]     f32
      o_ref : [1, TB]      f32   (lane-dense sigmoid output)
    """
    x_ref, o_ref = refs[0], refs[-1]
    wb_refs = refs[1:-1]

    h = x_ref[...].astype(jnp.float32)                       # [D, TB]

    # Hidden layers: Linear -> LeakyReLU(0.2)  (dropout = identity, eval mode)
    for i in range(n_layers):
        w = wb_refs[2 * i][...]                               # [hid, in] bf16
        b = wb_refs[2 * i + 1][...]                           # [hid, 1]  f32
        z = jnp.dot(w, h.astype(jnp.bfloat16),
                    preferred_element_type=jnp.float32) + b   # [hid, TB]
        h = jnp.where(z >= 0.0, z, 0.2 * z)                   # LeakyReLU(0.2)

    # Final layer: Linear(hid, 1) + Sigmoid, produced lane-dense as [1, TB].
    w_last = wb_refs[-2][...]                                 # [1, hid] bf16
    b_last = wb_refs[-1][...]                                 # [1, 1]   f32
    z = jnp.dot(w_last, h.astype(jnp.bfloat16),
                preferred_element_type=jnp.float32) + b_last  # [1, TB]
    sig = pl.reciprocal(1.0 + jnp.exp(-z), approx=True)       # EUP exp + recip
    o_ref[...] = sig.astype(o_ref.dtype)


# ----------------------------- Model wrapper ------------------------------- #

class DiscriminatorParams:
    def __init__(self, enc_dim, dis_layers, dis_hid_dim,
                 dis_dropout=0.0, dis_input_dropout=0.0):
        self.enc_dim = enc_dim
        self.dis_layers = dis_layers
        self.dis_hid_dim = dis_hid_dim
        self.dis_dropout = dis_dropout
        self.dis_input_dropout = dis_input_dropout


def init_discriminator_weights(key, params):
    """PyTorch-style init; weights stored as [out, in] bf16, biases [out, 1] f32."""
    weights = []
    for i in range(params.dis_layers + 1):
        in_dim = params.enc_dim if i == 0 else params.dis_hid_dim
        out_dim = 1 if i == params.dis_layers else params.dis_hid_dim
        key, kw, kb = jax.random.split(key, 3)
        bound = float(in_dim) ** -0.5
        w = jax.random.uniform(kw, (out_dim, in_dim), jnp.float32, -bound, bound)
        b = jax.random.uniform(kb, (out_dim, 1), jnp.float32, -bound, bound)
        weights.append((w.astype(jnp.bfloat16), b))
    return weights


def discriminator_forward(x, weights, params):
    assert x.ndim == 2 and x.shape[1] == params.enc_dim, (x.ndim, x.shape)
    B, D = x.shape
    n = params.dis_layers

    # Batch tile along lanes: multiple of 128 (lane width); >=256 when possible
    # so the MXU N dimension is well utilized on v6e/v7x.
    TB = 256 if B >= 256 else _round_up(B, 128)
    B_pad = _round_up(B, TB)

    xp = x if B_pad == B else jnp.pad(x, ((0, B_pad - B), (0, 0)))
    xt = xp.T  # [D, B_pad]: batch along lanes (lane-dense I/O), features on sublanes

    # Input dropout: identity in eval mode.
    flat_params = []
    in_specs = [pl.BlockSpec((D, TB), lambda i: (0, i))]
    for w, b in weights:
        flat_params += [w, b]
        in_specs.append(pl.BlockSpec(w.shape, lambda i: (0, 0)))  # VMEM-resident
        in_specs.append(pl.BlockSpec(b.shape, lambda i: (0, 0)))

    # Explicit VMEM budget: resident weights/biases + double-buffered x/out
    # tiles + per-layer activation tiles, with generous headroom (important on
    # v7x's 64 MiB physical VMEM).
    w_bytes = sum(int(a.size) * a.dtype.itemsize for a in flat_params)
    act_bytes = (D + 2 * params.dis_hid_dim + 1) * TB * 4
    io_bytes = 2 * (D * TB * 4 + TB * 4)
    vmem_limit = int(min(max(4 * (w_bytes + act_bytes + io_bytes), 8 << 20),
                         100 << 20))

    kernel = functools.partial(_mlp_fused_kernel, n_layers=n)
    out = pl.pallas_call(
        kernel,
        grid=(B_pad // TB,),
        in_specs=in_specs,
        out_specs=pl.BlockSpec((1, TB), lambda i: (0, i)),
        out_shape=jax.ShapeDtypeStruct((1, B_pad), jnp.float32),
        compiler_params=pltpu.CompilerParams(
            dimension_semantics=("parallel",),   # megacore split on v7x
            vmem_limit_bytes=vmem_limit,
        ),
    )(xt, *flat_params)

    return out.reshape(-1)[:B]  # [B]


# ------------------------------- Reference --------------------------------- #

def discriminator_reference(x, weights, params):
    h = x.astype(jnp.float32)
    n = params.dis_layers
    for i, (w, b) in enumerate(weights):
        z = jnp.dot(h.astype(jnp.bfloat16), jnp.transpose(w),
                    preferred_element_type=jnp.float32) + b.reshape(1, -1)
        if i < n:
            h = jnp.where(z >= 0.0, z, 0.2 * z)
        else:
            h = 1.0 / (1.0 + jnp.exp(-z))
    return h.reshape(-1)


# --------------------------------- Main ------------------------------------ #

if __name__ == "__main__":
    params = DiscriminatorParams(
        enc_dim=64, dis_layers=2, dis_hid_dim=128,
        dis_dropout=0.0, dis_input_dropout=0.1,
    )

    key = jax.random.PRNGKey(0)
    key, kx, kw = jax.random.split(key, 3)
    B = 500  # padded to 512 internally -> 2 grid steps of TB=256
    x = jax.random.normal(kx, (B, params.enc_dim), dtype=jnp.float32)
    weights = init_discriminator_weights(kw, params)

    out = jax.block_until_ready(discriminator_forward(x, weights, params))
    ref = discriminator_reference(x, weights, params)

    assert out.shape == (B,), out.shape
    assert bool(jnp.allclose(out, ref, atol=2e-3, rtol=2e-3)), (out[:8], ref[:8])

    print("KERNEL_OK")
</pallas_src>

<mosaic_0001>
module attributes {stable_mosaic.version = 11 : i64} {
  func.func @_mlp_fused_kernel(%arg0: i32, %arg1: memref<64x256xf32, #tpu.memory_space<vmem>>, %arg2: memref<128x64xbf16, #tpu.memory_space<vmem>>, %arg3: memref<128x1xf32, #tpu.memory_space<vmem>>, %arg4: memref<128x128xbf16, #tpu.memory_space<vmem>>, %arg5: memref<128x1xf32, #tpu.memory_space<vmem>>, %arg6: memref<1x128xbf16, #tpu.memory_space<vmem>>, %arg7: memref<1x1xf32, #tpu.memory_space<vmem>>, %arg8: memref<1x256xf32, #tpu.memory_space<vmem>>) attributes {dimension_semantics = [#tpu.dimension_semantics<parallel>], iteration_bounds = array<i64: 2>, scalar_prefetch = 0 : i64, scratch_operands = 0 : i64, tpu.core_type = #tpu.core_type<tc>, window_params = [{transform_indices = @transform_0, window_bounds = array<i64: 64, 256>}, {pipeline_mode = #tpu.pipeline_mode<synchronous>, transform_indices = @transform_1, window_bounds = array<i64: 128, 64>}, {pipeline_mode = #tpu.pipeline_mode<synchronous>, transform_indices = @transform_2, window_bounds = array<i64: 128, 1>}, {pipeline_mode = #tpu.pipeline_mode<synchronous>, transform_indices = @transform_3, window_bounds = array<i64: 128, 128>}, {pipeline_mode = #tpu.pipeline_mode<synchronous>, transform_indices = @transform_4, window_bounds = array<i64: 128, 1>}, {pipeline_mode = #tpu.pipeline_mode<synchronous>, transform_indices = @transform_5, window_bounds = array<i64: 1, 128>}, {pipeline_mode = #tpu.pipeline_mode<synchronous>, transform_indices = @transform_6, window_bounds = array<i64: 1, 1>}, {transform_indices = @transform_7, window_bounds = array<i64: 1, 256>}]} {
    %c0 = arith.constant 0 : index
    %c0_0 = arith.constant 0 : index
    %0 = vector.load %arg1[%c0, %c0_0] : memref<64x256xf32, #tpu.memory_space<vmem>>, vector<64x256xf32>
    %c0_1 = arith.constant 0 : index
    %c0_2 = arith.constant 0 : index
    %1 = vector.load %arg2[%c0_1, %c0_2] : memref<128x64xbf16, #tpu.memory_space<vmem>>, vector<128x64xbf16>
    %c0_3 = arith.constant 0 : index
    %c0_4 = arith.constant 0 : index
    %2 = vector.load %arg3[%c0_3, %c0_4] : memref<128x1xf32, #tpu.memory_space<vmem>>, vector<128x1xf32>
    %3 = arith.truncf %0 : vector<64x256xf32> to vector<64x256xbf16>
    %cst = arith.constant dense<0.000000e+00> : vector<128x256xf32>
    %4 = tpu.matmul %1, %3, %cst {dimension_numbers = #tpu.dot_dimension_numbers<[1], [0], [0], [1], [0, 0, 1, 1], [], []>} : vector<128x64xbf16>, vector<64x256xbf16>, vector<128x256xf32> -> vector<128x256xf32>
    %5 = vector.broadcast %2 : vector<128x1xf32> to vector<128x256xf32>
    %6 = arith.addf %4, %5 : vector<128x256xf32>
    %cst_5 = arith.constant 0.000000e+00 : f32
    %7 = vector.broadcast %cst_5 : f32 to vector<128x256xf32>
    %8 = arith.cmpf oge, %6, %7 : vector<128x256xf32>
    %cst_6 = arith.constant 2.000000e-01 : f32
    %9 = vector.broadcast %cst_6 : f32 to vector<128x256xf32>
    %10 = arith.mulf %9, %6 : vector<128x256xf32>
    %11 = arith.select %8, %6, %10 : vector<128x256xi1>, vector<128x256xf32>
    %c0_7 = arith.constant 0 : index
    %c0_8 = arith.constant 0 : index
    %12 = vector.load %arg4[%c0_7, %c0_8] : memref<128x128xbf16, #tpu.memory_space<vmem>>, vector<128x128xbf16>
    %c0_9 = arith.constant 0 : index
    %c0_10 = arith.constant 0 : index
    %13 = vector.load %arg5[%c0_9, %c0_10] : memref<128x1xf32, #tpu.memory_space<vmem>>, vector<128x1xf32>
    %14 = arith.truncf %11 : vector<128x256xf32> to vector<128x256xbf16>
    %cst_11 = arith.constant dense<0.000000e+00> : vector<128x256xf32>
    %15 = tpu.matmul %12, %14, %cst_11 {dimension_numbers = #tpu.dot_dimension_numbers<[1], [0], [0], [1], [0, 0, 1, 1], [], []>} : vector<128x128xbf16>, vector<128x256xbf16>, vector<128x256xf32> -> vector<128x256xf32>
    %16 = vector.broadcast %13 : vector<128x1xf32> to vector<128x256xf32>
    %17 = arith.addf %15, %16 : vector<128x256xf32>
    %cst_12 = arith.constant 0.000000e+00 : f32
    %18 = vector.broadcast %cst_12 : f32 to vector<128x256xf32>
    %19 = arith.cmpf oge, %17, %18 : vector<128x256xf32>
    %cst_13 = arith.constant 2.000000e-01 : f32
    %20 = vector.broadcast %cst_13 : f32 to vector<128x256xf32>
    %21 = arith.mulf %20, %17 : vector<128x256xf32>
    %22 = arith.select %19, %17, %21 : vector<128x256xi1>, vector<128x256xf32>
    %c0_14 = arith.constant 0 : index
    %c0_15 = arith.constant 0 : index
    %23 = vector.load %arg6[%c0_14, %c0_15] : memref<1x128xbf16, #tpu.memory_space<vmem>>, vector<1x128xbf16>
    %c0_16 = arith.constant 0 : index
    %c0_17 = arith.constant 0 : index
    %24 = vector.load %arg7[%c0_16, %c0_17] : memref<1x1xf32, #tpu.memory_space<vmem>>, vector<1x1xf32>
    %25 = arith.truncf %22 : vector<128x256xf32> to vector<128x256xbf16>
    %cst_18 = arith.constant dense<0.000000e+00> : vector<1x256xf32>
    %26 = tpu.matmul %23, %25, %cst_18 {dimension_numbers = #tpu.dot_dimension_numbers<[1], [0], [0], [1], [0, 0, 1, 1], [], []>} : vector<1x128xbf16>, vector<128x256xbf16>, vector<1x256xf32> -> vector<1x256xf32>
    %27 = vector.broadcast %24 : vector<1x1xf32> to vector<1x256xf32>
    %28 = arith.addf %26, %27 : vector<1x256xf32>
    %cst_19 = arith.constant 0.000000e+00 : f32
    %29 = vector.broadcast %cst_19 : f32 to vector<1x256xf32>
    %30 = arith.subf %29, %28 : vector<1x256xf32>
    %31 = math.exp %30 : vector<1x256xf32>
    %cst_20 = arith.constant 1.000000e+00 : f32
    %32 = vector.broadcast %cst_20 : f32 to vector<1x256xf32>
    %33 = arith.addf %32, %31 : vector<1x256xf32>
    %34 = tpu.reciprocal %33 {approx = true} : vector<1x256xf32> -> vector<1x256xf32>
    %c0_21 = arith.constant 0 : index
    %c0_22 = arith.constant 0 : index
    %35 = vector.load %arg8[%c0_21, %c0_22] : memref<1x256xf32, #tpu.memory_space<vmem>>, vector<1x256xf32>
    tpu.vector_store %arg8[%c0_21, %c0_22], %34 {strides = array<i32>} : memref<1x256xf32, #tpu.memory_space<vmem>>, vector<1x256xf32>,
    return
  }
  func.func @transform_0(%arg0: i32) -> (i32, i32) {
    %c0_i32 = arith.constant 0 : i32
    %c0_i32_0 = arith.constant 0 : i32
    return %c0_i32, %arg0 : i32, i32
  }
  func.func @transform_1(%arg0: i32) -> (i32, i32) {
    %c0_i32 = arith.constant 0 : i32
    %c0_i32_0 = arith.constant 0 : i32
    %c0_i32_1 = arith.constant 0 : i32
    return %c0_i32, %c0_i32_0 : i32, i32
  }
  func.func @transform_2(%arg0: i32) -> (i32, i32) {
    %c0_i32 = arith.constant 0 : i32
    %c0_i32_0 = arith.constant 0 : i32
    %c0_i32_1 = arith.constant 0 : i32
    return %c0_i32, %c0_i32_0 : i32, i32
  }
  func.func @transform_3(%arg0: i32) -> (i32, i32) {
    %c0_i32 = arith.constant 0 : i32
    %c0_i32_0 = arith.constant 0 : i32
    %c0_i32_1 = arith.constant 0 : i32
    return %c0_i32, %c0_i32_0 : i32, i32
  }
  func.func @transform_4(%arg0: i32) -> (i32, i32) {
    %c0_i32 = arith.constant 0 : i32
    %c0_i32_0 = arith.constant 0 : i32
    %c0_i32_1 = arith.constant 0 : i32
    return %c0_i32, %c0_i32_0 : i32, i32
  }
  func.func @transform_5(%arg0: i32) -> (i32, i32) {
    %c0_i32 = arith.constant 0 : i32
    %c0_i32_0 = arith.constant 0 : i32
    %c0_i32_1 = arith.constant 0 : i32
    return %c0_i32, %c0_i32_0 : i32, i32
  }
  func.func @transform_6(%arg0: i32) -> (i32, i32) {
    %c0_i32 = arith.constant 0 : i32
    %c0_i32_0 = arith.constant 0 : i32
    %c0_i32_1 = arith.constant 0 : i32
    return %c0_i32, %c0_i32_0 : i32, i32
  }
  func.func @transform_7(%arg0: i32) -> (i32, i32) {
    %c0_i32 = arith.constant 0 : i32
    %c0_i32_0 = arith.constant 0 : i32
    return %c0_i32, %arg0 : i32, i32
  }
}

</mosaic_0001>

<bundles_post_ra>
// kernel: tpu_custom_call.1
= control target key start
LH: loop header
LB: loop body
LE: loop exit
PB: predicated region body
PF: predicated region fallthrough
CT: control target
= control target key end

     0   :  { %s1827_s0 = inlined_call_operand.vmem [shape: f32[64,512], index: 0, kind: input, shape index: {}]   ;;  %s1828_s1 = inlined_call_operand.vmem [shape: bf16[128,64], index: 1, kind: input, shape index: {}]   ;;  %s1829_s2 = inlined_call_operand.vmem [shape: f32[128,1], index: 2, kind: input, shape index: {}]   ;;  %s1830_s3 = inlined_call_operand.vmem [shape: bf16[128,128], index: 3, kind: input, shape index: {}]   ;;  %s1831_s4 = inlined_call_operand.vmem [shape: f32[128,1], index: 4, kind: input, shape index: {}]   ;;  %s1832_s5 = inlined_call_operand.vmem [shape: bf16[1,128], index: 5, kind: input, shape index: {}]   ;;  %s1833_s6 = inlined_call_operand.<no memory space> [shape: f32[1,1], index: 6, kind: input, shape index: {}]   ;;  %s1834_s7 = inlined_call_operand.hbm [shape: f32[1,512], index: 7, kind: output, shape index: {}]  }
   0x1   :  { %v12_v0 = vstv %s1833_s6 }
   0x2   :  { %13 = vst [vmem:[#allocation2] sm:$0x1] %v12_v0 }
   0x3   :  { %14 = vsyncpa [#allocation5], 0 }
   0x4   :  { %16 = vsyncpa [#allocation5 + $0x1], 0  ;;  %s1525_s26 = smov 0   ;;  %s1527_s27 = smov 0  }
   0x5   :  { %s1529_s28 = smov 0   ;;  %s1531_s29 = smov 0  }
   0x6 LB: > { %s1307_s6 = sadd.s32 4294967295, %s1477_s29   ;;  %s1308_s30 = sadd.s32 4294967294, %s1477_s29   ;;  %s1477_s29 = sphi %s1531_s29, %s1840_s29   ;;  %s1473_s28 = sphi %s1529_s28, %s1839_s28   ;;  %s1469_s27 = sphi %s1527_s27, %s1838_s27   ;;  %s1465_s26 = sphi %s1525_s26, %s1837_s26  }
   0x7   : > { %s1548_s8 = sadd.s32 1, %s1477_s29   ;;  %s29_s9 = sadd.s32 1, %s1473_s28 }
   0x8   : > { %s26_s10 = ssub.s32 %s1477_s29, %s1548_s8  ;;  %p36_p0 = scmp.ne.s32.totalorder %s1473_s28, %s1469_s27 }
   0x9   : > { %p27_p1 = scmp.eq.s32.totalorder %s26_s10, 0  ;;  %p37_p2 = scmp.eq.s32.totalorder %s1477_s29, 0 }
   0xa   : > { %p192_p3 = scmp.eq.s32.totalorder %s1307_s6, 1  ;;  %p197_p4 = scmp.ne.s32.totalorder %s1469_s27, %s1465_s26 }
   0xb   : > { %s1561_s11 = scalar_select %p27_p1, %s1473_s28, %s29_s9  }
   0xc   : > { %p38_p5 = por %p37_p2, %p36_p0  ;;  %p1563_p6 = por %p192_p3, %p36_p0 }
   0xd   : > { %p198_p7 = scmp.eq.s32.totalorder %s1308_s30, 1  ;;  %p1310_p9 = scmp.ge.s32.totalorder %s1477_s29, 2 }
   0xf   : > { %p1567_p8 = por %p198_p7, %p197_p4  ;;  %232 = sbr.rel (%p1310_p9) target bundleno = 34 (0x22), region = 40 }
  0x16   : > { %235 = sbr.rel (!%p38_p5) target bundleno = 34 (0x22), region = 44  ;;  %s237_s14 = sand.u32 (%p38_p5), 1, %s1473_s28  }
  0x17   : > { %s1346_s15 = sshll.u32 (%p38_p5), %s1477_s29, 4  ;;  %s1311_s16 = sshll.u32 (%p38_p5), %s237_s14, 7 }
  0x18   : > { %s1579_s19 = scalar_lea.vmem (%p38_p5), %s1827_s0, %s1346_s15  ;;  %s239_s20 = scalar_lea.vmem (%p38_p5), [#allocation3], %s1311_s16 }
  0x19   : > { %v255_v1 = vld [vmem:[%s1579_s19] sm:$0xff] (%p38_p5)  ;;  %v257_v2 = vld [vmem:[%s1579_s19 + $0x8] sm:$0xff] (%p38_p5) }
  0x1a   : > { %v259_v3 = vld [vmem:[%s1579_s19 + $0x20] sm:$0xff] (%p38_p5)  ;;  %256 = vst [vmem:[%s239_s20] sm:$0xff] (%p38_p5), %v255_v1  ;;  %258 = vst [vmem:[%s239_s20 + $0x8] sm:$0xff] (%p38_p5), %v257_v2  ;;  %v261_v4 = vld [vmem:[%s1579_s19 + $0x28] sm:$0xff] (%p38_p5) }
  0x1b   : > { %260 = vst [vmem:[%s239_s20 + $0x10] sm:$0xff] (%p38_p5), %v259_v3  ;;  %v263_v5 = vld [vmem:[%s1579_s19 + $0x40] sm:$0xff] (%p38_p5)  ;;  %v265_v6 = vld [vmem:[%s1579_s19 + $0x48] sm:$0xff] (%p38_p5)  ;;  %262 = vst [vmem:[%s239_s20 + $0x18] sm:$0xff] (%p38_p5), %v261_v4 }
  0x1c   : > { %264 = vst [vmem:[%s239_s20 + $0x20] sm:$0xff] (%p38_p5), %v263_v5  ;;  %266 = vst [vmem:[%s239_s20 + $0x28] sm:$0xff] (%p38_p5), %v265_v6  ;;  %v267_v7 = vld [vmem:[%s1579_s19 + $0x60] sm:$0xff] (%p38_p5)  ;;  %v269_v8 = vld [vmem:[%s1579_s19 + $0x68] sm:$0xff] (%p38_p5) }
  0x1d   : > { %v271_v9 = vld [vmem:[%s1579_s19 + $0x80] sm:$0xff]  ;;  %268 = vst [vmem:[%s239_s20 + $0x30] sm:$0xff] %v267_v7  ;;  %270 = vst [vmem:[%s239_s20 + $0x38] sm:$0xff] %v269_v8  ;;  %v273_v10 = vld [vmem:[%s1579_s19 + $0x88] sm:$0xff] }
  0x1e   : > { %272 = vst [vmem:[%s239_s20 + $0x40] sm:$0xff] %v271_v9  ;;  %v275_v11 = vld [vmem:[%s1579_s19 + $0xa0] sm:$0xff]  ;;  %v277_v12 = vld [vmem:[%s1579_s19 + $0xa8] sm:$0xff]  ;;  %274 = vst [vmem:[%s239_s20 + $0x48] sm:$0xff] %v273_v10 }
  0x1f   : > { %276 = vst [vmem:[%s239_s20 + $0x50] sm:$0xff] %v275_v11  ;;  %278 = vst [vmem:[%s239_s20 + $0x58] sm:$0xff] %v277_v12  ;;  %v279_v13 = vld [vmem:[%s1579_s19 + $0xc0] sm:$0xff]  ;;  %v281_v14 = vld [vmem:[%s1579_s19 + $0xc8] sm:$0xff] }
  0x20   : > { %v283_v15 = vld [vmem:[%s1579_s19 + $0xe0] sm:$0xff]  ;;  %280 = vst [vmem:[%s239_s20 + $0x60] sm:$0xff] %v279_v13  ;;  %282 = vst [vmem:[%s239_s20 + $0x68] sm:$0xff] %v281_v14  ;;  %v285_v16 = vld [vmem:[%s1579_s19 + $0xe8] sm:$0xff] }
  0x21   : > { %284 = vst [vmem:[%s239_s20 + $0x70] sm:$0xff] %v283_v15  ;;  %286 = vst [vmem:[%s239_s20 + $0x78] sm:$0xff] %v285_v16 }
  0x22 PF: > { %p1314_p10 = scmp.ge.s32.totalorder %s1477_s29, 1  ;;  %p291_p11 = scmp.lt.s32.totalorder %s1477_s29, 3 }
  0x24   : > { %p292_p12 = pnand %p1314_p10, %p291_p11 }
  0x25   : > { %s1600_s21 = sand.u32 (!%p292_p12), 1, %s1469_s27   ;;  %v1479_v17 = vmov (!%p292_p12), 0   ;;  %v364_v39 = vld [vmem:[%s1829_s2] sm:$0xff] (!%p292_p12)  ;;  %v365_v42 = vld [vmem:[%s1829_s2 + $0x8] sm:$0xff] (!%p292_p12)  ;;  %v366_v43 = vld [vmem:[%s1829_s2 + $0x10] sm:$0xff] (!%p292_p12)  ;;  %vm508_vm0 = vcmask (!%p292_p12), 523264  }
  0x26   : > { %295 = sbr.rel (%p292_p12) target bundleno = 886 (0x376), region = 67  ;;  %s1315_s22 = sshll.u32 (!%p292_p12), %s1600_s21, 7  ;;  %565 = vmatprep.mubr.bf16.mxu0 (!%p292_p12), %v1479_v17  ;;  %1389 = vset.pattern.permute.xlu0 (!%p292_p12), %v1479_v17  ;;  %v367_v45 = vld [vmem:[%s1829_s2 + $0x18] sm:$0xff] (!%p292_p12)  ;;  %v368_v46 = vld [vmem:[%s1829_s2 + $0x20] sm:$0xff] (!%p292_p12)  ;;  %v369_v48 = vld [vmem:[%s1829_s2 + $0x28] sm:$0xff] (!%p292_p12) }
  0x27   : > { %1390 = vset.pattern.permute.xlu1 (!%p292_p12), %v1479_v17  ;;  %950 = vmatprep.mubr.bf16.mxu1 (!%p292_p12), %v1479_v17  ;;  %s300_s23 = scalar_lea.vmem (!%p292_p12), [#allocation3], %s1315_s22  ;;  %v1391_v47 = vld [vmem:[%s1828_s1] sm:$0xff] (!%p292_p12)   ;;  %v370_v49 = vld [vmem:[%s1829_s2 + $0x30] sm:$0xff] (!%p292_p12)  ;;  %v371_v50 = vld [vmem:[%s1829_s2 + $0x38] sm:$0xff] (!%p292_p12)  ;;  %s1316_s24 = sshll.u32 (!%p292_p12), %s1600_s21, 1 }
  0x28   : > { %v333_v18 = vld [vmem:[%s300_s23 + $0x8] sm:$0xff] (!%p292_p12)  ;;  %v335_v19 = vld [vmem:[%s300_s23 + $0x18] sm:$0xff] (!%p292_p12)  ;;  %v332_v20 = vld [vmem:[%s300_s23] sm:$0xff] (!%p292_p12)  ;;  %390 = vperm.xlu0 (!%p292_p12), %1389, %v364_v39   ;;  %400 = vperm.xlu1 (!%p292_p12), %1390, %v366_v43   ;;  %s1347_s25 = sshll.u32 (!%p292_p12), %s1307_s6, 5  ;;  %s328_s30 = scalar_lea.vmem (!%p292_p12), [#allocation4], %s1316_s24 }
  0x29   : > { %v381_v21 = vpack.c.bf16 (!%p292_p12), %v335_v19, %v333_v18  ;;  %v334_v22 = vld [vmem:[%s300_s23 + $0x10] sm:$0xff] (!%p292_p12)  ;;  %v337_v23 = vld [vmem:[%s300_s23 + $0x28] sm:$0xff] (!%p292_p12)  ;;  %v339_v24 = vld [vmem:[%s300_s23 + $0x38] sm:$0xff] (!%p292_p12)  ;;  %s1243_s9 = sshll.u32 (!%p292_p12), %s328_s30, 4  ;;  %s1783_s15 = scalar_lea.hbm (!%p292_p12), %s1834_s7, %s1347_s25  ;;  %s1785_s9 = int_to_ptr.vmem [resolvable:$true] %s1243_s9 }
  0x2a   : > { %v380_v25 = vpack.c.bf16 (!%p292_p12), %v334_v22, %v332_v20  ;;  %v383_v26 = vpack.c.bf16 (!%p292_p12), %v339_v24, %v337_v23  ;;  %v336_v27 = vld [vmem:[%s300_s23 + $0x20] sm:$0xff] (!%p292_p12)  ;;  %v338_v28 = vld [vmem:[%s300_s23 + $0x30] sm:$0xff] (!%p292_p12)  ;;  %v341_v29 = vld [vmem:[%s300_s23 + $0x48] sm:$0xff] (!%p292_p12)  ;;  %s1229_s16 = scalar_lea.sflag (!%p292_p12), [#allocation5], %s1600_s21  ;;  %s1415_s17 = scalar_lea.vmem (!%p292_p12), %s1785_s9, 32 }
  0x2b   : > { %533 = vmatprep.subr.bf16.mxu0 (!%p292_p12), %v381_v21  ;;  %v343_v30 = vld [vmem:[%s300_s23 + $0x58] sm:$0xff] (!%p292_p12)  ;;  %v382_v31 = vpack.c.bf16 (!%p292_p12), %v338_v28, %v336_v27  ;;  %v340_v32 = vld [vmem:[%s300_s23 + $0x40] sm:$0xff] (!%p292_p12)  ;;  %v342_v33 = vld [vmem:[%s300_s23 + $0x50] sm:$0xff] (!%p292_p12)  ;;  %p1416_p13 = scmp.ne.s32.totalorder (!%p292_p12), %s1785_s9, %s1415_s17  ;;  %s1481_s6 = smov (!%p292_p12), [#allocation4]  }
  0x2c   : > { %534 = vmatpush1.bf16.msra.mxu0 (!%p292_p12), %v380_v25  ;;  %v385_v34 = vpack.c.bf16 (!%p292_p12), %v343_v30, %v341_v29  ;;  %v345_v35 = vld [vmem:[%s300_s23 + $0x68] sm:$0xff] (!%p292_p12)  ;;  %v347_v36 = vld [vmem:[%s300_s23 + $0x78] sm:$0xff] (!%p292_p12)  ;;  %v384_v37 = vpack.c.bf16 (!%p292_p12), %v342_v33, %v340_v32  ;;  %v344_v38 = vld [vmem:[%s300_s23 + $0x60] sm:$0xff] (!%p292_p12)  ;;  %395 = vperm.xlu0 (!%p292_p12), %1389, %v365_v42   ;;  %s1419_s18 = sshll.u32 (!%p292_p12), %s1481_s6, 4  ;;  %s1420_s18 = int_to_ptr.vmem [resolvable:$false] %s1419_s18 }
  0x2d   : > { %535 = vmatprep.subr.bf16.mxu0 %v383_v26  ;;  %v387_v40 = vpack.c.bf16 %v347_v36, %v345_v35  ;;  %v346_v41 = vld [vmem:[%s300_s23 + $0x70] sm:$0xff]  ;;  %405 = vperm.xlu1 %1390, %v367_v45   ;;  %v1392_v51 = vld [vmem:[%s1828_s1 + $0x8] sm:$0xff]   ;;  %v372_v52 = vld [vmem:[%s1829_s2 + $0x40] sm:$0xff]  ;;  %p1417_p0 = pnand %p1416_p13, %p1563_p6  ;;  %s1421_s19 = scalar_lea.vmem %s1420_s18, 64 }
  0x2e   : > { %v386_v44 = vpack.c.bf16 %v346_v41, %v344_v38  ;;  %v373_v53 = vld [vmem:[%s1829_s2 + $0x48] sm:$0xff]  ;;  %v374_v54 = vld [vmem:[%s1829_s2 + $0x50] sm:$0xff]  ;;  %v375_v55 = vld [vmem:[%s1829_s2 + $0x58] sm:$0xff]  ;;  %p1422_p2 = scmp.lt.s32.totalorder %s1785_s9, %s1420_s18  ;;  %p1423_p3 = scmp.lt.s32.totalorder %s1421_s19, %s1415_s17 }
  0x2f   : > { %v376_v56 = vld [vmem:[%s1829_s2 + $0x60] sm:$0xff]  ;;  %v1393_v57 = vld [vmem:[%s1828_s1 + $0x10] sm:$0xff]   ;;  %v377_v58 = vld [vmem:[%s1829_s2 + $0x68] sm:$0xff]  ;;  %p1418_p1 = pneg %p1417_p0 }
  0x30   : > { %536 = vmatpush1.bf16.msra.mxu0 %v382_v31  ;;  %410 = vperm.xlu0 %1389, %v368_v46   ;;  %v378_v59 = vld [vmem:[%s1829_s2 + $0x70] sm:$0xff]  ;;  %v379_v60 = vld [vmem:[%s1829_s2 + $0x78] sm:$0xff]  ;;  %v758_v61 = vld [vmem:[%s1831_s4] sm:$0xff]  ;;  %p1424_p4 = por %p1423_p3, %p1422_p2 }
  0x31   : > { %537 = vmatprep.subr.bf16.mxu0 %v385_v34  ;;  %415 = vperm.xlu1 %1390, %v369_v48   ;;  %v1394_v62 = vld [vmem:[%s1828_s1 + $0x18] sm:$0xff]   ;;  %v759_v63 = vld [vmem:[%s1831_s4 + $0x8] sm:$0xff]  ;;  %v760_v0 = vld [vmem:[%s1831_s4 + $0x10] sm:$0xff] }
  0x32   : > { %v761_v1 = vld [vmem:[%s1831_s4 + $0x18] sm:$0xff]  ;;  %v762_v2 = vld [vmem:[%s1831_s4 + $0x20] sm:$0xff]  ;;  %v763_v4 = vld [vmem:[%s1831_s4 + $0x28] sm:$0xff]  ;;  %p1425_p5 = pnand %p1424_p4, %p1418_p1 }
  0x33   : > { %v1395_v3 = vld [vmem:[%s1828_s1 + $0x20] sm:$0xff]   ;;  %v764_v5 = vld [vmem:[%s1831_s4 + $0x30] sm:$0xff]  ;;  %v765_v6 = vld [vmem:[%s1831_s4 + $0x38] sm:$0xff] }
  0x34   : > { %538 = vmatpush1.bf16.msra.mxu0 %v384_v37  ;;  %420 = vperm.xlu0 %1389, %v370_v49   ;;  %v766_v7 = vld [vmem:[%s1831_s4 + $0x40] sm:$0xff]  ;;  %v1396_v8 = vld [vmem:[%s1828_s1 + $0x28] sm:$0xff]   ;;  %v768_v10 = vld [vmem:[%s1831_s4 + $0x50] sm:$0xff] }
  0x35   : > { %539 = vmatprep.subr.bf16.mxu0 %v387_v40  ;;  %425 = vperm.xlu1 %1390, %v371_v50   ;;  %v767_v9 = vld [vmem:[%s1831_s4 + $0x48] sm:$0xff]  ;;  %v769_v11 = vld [vmem:[%s1831_s4 + $0x58] sm:$0xff]  ;;  %v770_v12 = vld [vmem:[%s1831_s4 + $0x60] sm:$0xff] }
  0x36   : > { %v1397_v13 = vld [vmem:[%s1828_s1 + $0x30] sm:$0xff]   ;;  %v771_v14 = vld [vmem:[%s1831_s4 + $0x68] sm:$0xff]  ;;  %v773_v16 = vld [vmem:[%s1831_s4 + $0x78] sm:$0xff] }
  0x37   : > { %v772_v15 = vld [vmem:[%s1831_s4 + $0x70] sm:$0xff]  ;;  %v1128_v18 = vld [vmem:[#allocation2] sm:$0x1]  ;;  %v1398_v19 = vld [vmem:[%s1828_s1 + $0x38] sm:$0xff]  }
  0x38   : > { %540 = vmatpush1.bf16.msra.mxu0 %v386_v44  ;;  %430 = vperm.xlu0 %1389, %v372_v52  }
  0x39   : > { %435 = vperm.xlu1 %1390, %v373_v53  }
  0x3b   : > { %1325 = vmatmul.mubr.msk.bf16.vlgmr.msra.gmra.mrb[0].mxu0 %vm508_vm0, %v1391_v47 }
  0x3c   : > { %575 = vmatprep.mubr.bf16.mxu0 %v1479_v17  ;;  %440 = vperm.xlu0 %1389, %v374_v54  }
  0x3d   : > { %445 = vperm.xlu1 %1390, %v375_v55  }
  0x40   : > { %450 = vperm.xlu0 %1389, %v376_v56  }
  0x41   : > { %455 = vperm.xlu1 %1390, %v377_v58  }
  0x43   : > { %1326 = vmatmul.mubr.msk.bf16.gmra.mrb[4].mxu0 %vm508_vm0, %v1392_v51 }
  0x44   : > { %585 = vmatprep.mubr.bf16.mxu0 %v1479_v17  ;;  %460 = vperm.xlu0 %1389, %v378_v59  }
  0x45   : > { %465 = vperm.xlu1 %1390, %v379_v60  }
  0x48   : > { %792 = vperm.xlu0 %1389, %v758_v61  }
  0x49   : > { %797 = vperm.xlu1 %1390, %v759_v63  }
  0x4b   : > { %1327 = vmatmul.mubr.msk.bf16.gmra.mrb[8].mxu0 %vm508_vm0, %v1393_v57 }
  0x4c   : > { %595 = vmatprep.mubr.bf16.mxu0 %v1479_v17  ;;  %802 = vperm.xlu0 %1389, %v760_v0  }
  0x4d   : > { %807 = vperm.xlu1 %1390, %v761_v1  }
  0x50   : > { %812 = vperm.xlu0 %1389, %v762_v2  }
  0x51   : > { %817 = vperm.xlu1 %1390, %v763_v4  }
  0x53   : > { %1328 = vmatmul.mubr.msk.bf16.gmra.mrb[12].mxu0 %vm508_vm0, %v1394_v62 }
  0x54   : > { %605 = vmatprep.mubr.bf16.mxu0 %v1479_v17  ;;  %822 = vperm.xlu0 %1389, %v764_v5  }
  0x55   : > { %827 = vperm.xlu1 %1390, %v765_v6  }
  0x58   : > { %832 = vperm.xlu0 %1389, %v766_v7  }
  0x59   : > { %837 = vperm.xlu1 %1390, %v767_v9  }
  0x5b   : > { %1329 = vmatmul.mubr.msk.bf16.gmra.mrb[16].mxu0 %vm508_vm0, %v1395_v3 }
  0x5c   : > { %615 = vmatprep.mubr.bf16.mxu0 %v1479_v17  ;;  %842 = vperm.xlu0 %1389, %v768_v10  }
  0x5d   : > { %847 = vperm.xlu1 %1390, %v769_v11  }
  0x60   : > { %852 = vperm.xlu0 %1389, %v770_v12  }
  0x61   : > { %857 = vperm.xlu1 %1390, %v771_v14  }
  0x63   : > { %1330 = vmatmul.mubr.msk.bf16.gmra.mrb[20].mxu0 %vm508_vm0, %v1396_v8 }
  0x64   : > { %625 = vmatprep.mubr.bf16.mxu0 %v1479_v17  ;;  %862 = vperm.xlu0 %1389, %v772_v15  }
  0x65   : > { %867 = vperm.xlu1 %1390, %v773_v16  }
  0x68   : > { %1147 = vperm.xlu0 %1389, %v1128_v18  }
  0x6b   : > { %1331 = vmatmul.mubr.msk.bf16.gmra.mrb[24].mxu0 %vm508_vm0, %v1397_v13 }
  0x6c   : > { %635 = vmatprep.mubr.bf16.mxu0 %v1479_v17 }
  0x73   : > { %1332 = vmatmul.mubr.msk.bf16.gmra.mrb[28].mxu0 %vm508_vm0, %v1398_v19 }
  0x74   : > { %1186 = vmatprep.mubr.bf16.mxu0 %v1479_v17 }
  0xa7   : > { %v391_v20 = vpop.permute.xlu0 %390  ;;  %v401_v30 = vpop.permute.xlu1 %400 }
  0xab   : > { %v396_v24 = vpop.permute.xlu0 %395 }
  0xac   : > { %v406_v44 = vpop.permute.xlu1 %405 }
  0xaf   : > { %v411_v56 = vpop.permute.xlu0 %410 }
  0xb0   : > { %v416_v0 = vpop.permute.xlu1 %415 }
  0xb3   : > { %v421_v12 = vpop.permute.xlu0 %420 }
 0x10e   : > { %v567_v21 = vpop.f32.mrb[0].mxu0 }
 0x10f   : > { %v568_v22 = vadd.f32 %v567_v21, %v391_v20  ;;  %v569_v23 = vpop.f32.mrb[1].mxu0  ;;  %v426_v21 = vpop.permute.xlu1 %425 }
 0x110   : > { %v570_v25 = vadd.f32 %v569_v23, %v391_v20  ;;  %v571_v26 = vpop.f32.mrb[2].mxu0 }
 0x111   : > { %v678_v27 = vmul.f32 0.2, %v568_v22  ;;  %v572_v28 = vadd.f32 %v571_v26, %v396_v24  ;;  %v573_v29 = vpop.f32.mrb[3].mxu0  ;;  %vm646_vm1 = vcmp.ge.f32.partialorder %v568_v22, 0.0 }
 0x112   : > { %v679_v31 = vmul.f32 0.2, %v570_v25  ;;  %v574_v32 = vadd.f32 %v573_v29, %v396_v24  ;;  %vm647_vm2 = vcmp.ge.f32.partialorder %v570_v25, 0.0 }
 0x113   : > { %v680_v33 = vmul.f32 0.2, %v572_v28  ;;  %vm648_vm3 = vcmp.ge.f32.partialorder %v572_v28, 0.0  ;;  %v710_v35 = vsel %vm646_vm1, %v568_v22, %v678_v27 }
 0x114   : > { %v681_v34 = vmul.f32 0.2, %v574_v32  ;;  %vm649_vm4 = vcmp.ge.f32.partialorder %v574_v32, 0.0  ;;  %v711_v38 = vsel %vm647_vm2, %v570_v25, %v679_v31 }
 0x115   : > { %v712_v36 = vsel %vm648_vm3, %v572_v28, %v680_v33  ;;  %v431_v33 = vpop.permute.xlu0 %430 }
 0x116   : > { %v577_v37 = vpop.f32.mrb[4].mxu0  ;;  %v713_v39 = vsel %vm649_vm4, %v574_v32, %v681_v34  ;;  %v774_v40 = vpack.c.bf16 %v712_v36, %v710_v35 }
 0x117   : > { %v578_v41 = vadd.f32 %v577_v37, %v401_v30  ;;  %v579_v42 = vpop.f32.mrb[5].mxu0  ;;  %v775_v43 = vpack.c.bf16 %v713_v39, %v711_v38 }
 0x118   : > { %v580_v45 = vadd.f32 %v579_v42, %v401_v30  ;;  %v581_v46 = vpop.f32.mrb[6].mxu0 }
 0x119   : > { %v682_v47 = vmul.f32 0.2, %v578_v41  ;;  %v582_v48 = vadd.f32 %v581_v46, %v406_v44  ;;  %v583_v49 = vpop.f32.mrb[7].mxu0  ;;  %918 = vmatprep.subr.bf16.mxu1 %v775_v43  ;;  %vm650_vm5 = vcmp.ge.f32.partialorder %v578_v41, 0.0 }
 0x11a   : > { %v683_v50 = vmul.f32 0.2, %v580_v45  ;;  %v584_v51 = vadd.f32 %v583_v49, %v406_v44  ;;  %919 = vmatpush1.bf16.msra.mxu1 %v774_v40  ;;  %vm651_vm6 = vcmp.ge.f32.partialorder %v580_v45, 0.0 }
 0x11b   : > { %vm652_vm7 = vcmp.ge.f32.partialorder %v582_v48, 0.0  ;;  %v684_v52 = vmul.f32 0.2, %v582_v48  ;;  %v714_v54 = vsel %vm650_vm5, %v578_v41, %v682_v47  ;;  %v436_v41 = vpop.permute.xlu1 %435 }
 0x11c   : > { %vm653_vm8 = vcmp.ge.f32.partialorder %v584_v51, 0.0  ;;  %v685_v53 = vmul.f32 0.2, %v584_v51  ;;  %v715_v58 = vsel %vm651_vm6, %v580_v45, %v683_v50 }
 0x11d   : > { %v716_v55 = vsel %vm652_vm7, %v582_v48, %v684_v52 }
 0x11e   : > { %v587_v57 = vpop.f32.mrb[8].mxu0  ;;  %v717_v59 = vsel %vm653_vm8, %v584_v51, %v685_v53  ;;  %v776_v60 = vpack.c.bf16 %v716_v55, %v714_v54  ;;  %v441_v53 = vpop.permute.xlu0 %440 }
 0x11f   : > { %v588_v61 = vadd.f32 %v587_v57, %v411_v56  ;;  %v589_v62 = vpop.f32.mrb[9].mxu0  ;;  %v777_v63 = vpack.c.bf16 %v717_v59, %v715_v58 }
 0x120   : > { %v590_v1 = vadd.f32 %v589_v62, %v411_v56  ;;  %v591_v2 = vpop.f32.mrb[10].mxu0 }
 0x121   : > { %v686_v3 = vmul.f32 0.2, %v588_v61  ;;  %v592_v4 = vadd.f32 %v591_v2, %v416_v0  ;;  %v593_v5 = vpop.f32.mrb[11].mxu0  ;;  %920 = vmatprep.subr.bf16.mxu1 %v777_v63  ;;  %vm654_vm9 = vcmp.ge.f32.partialorder %v588_v61, 0.0 }
 0x122   : > { %v687_v6 = vmul.f32 0.2, %v590_v1  ;;  %v594_v7 = vadd.f32 %v593_v5, %v416_v0  ;;  %921 = vmatpush1.bf16.msra.mxu1 %v776_v60  ;;  %vm655_vm10 = vcmp.ge.f32.partialorder %v590_v1, 0.0 }
 0x123   : > { %vm656_vm11 = vcmp.ge.f32.partialorder %v592_v4, 0.0  ;;  %v688_v8 = vmul.f32 0.2, %v592_v4  ;;  %v718_v10 = vsel %vm654_vm9, %v588_v61, %v686_v3  ;;  %v446_v61 = vpop.permute.xlu1 %445 }
 0x124   : > { %vm657_vm12 = vcmp.ge.f32.partialorder %v594_v7, 0.0  ;;  %v689_v9 = vmul.f32 0.2, %v594_v7  ;;  %v719_v14 = vsel %vm655_vm10, %v590_v1, %v687_v6 }
 0x125   : > { %v720_v11 = vsel %vm656_vm11, %v592_v4, %v688_v8 }
 0x126   : > { %v597_v13 = vpop.f32.mrb[12].mxu0  ;;  %v721_v15 = vsel %vm657_vm12, %v594_v7, %v689_v9  ;;  %v778_v16 = vpack.c.bf16 %v720_v11, %v718_v10  ;;  %v451_v9 = vpop.permute.xlu0 %450 }
 0x127   : > { %v598_v18 = vadd.f32 %v597_v13, %v421_v12  ;;  %v599_v19 = vpop.f32.mrb[13].mxu0  ;;  %v779_v20 = vpack.c.bf16 %v721_v15, %v719_v14 }
 0x128   : > { %v600_v22 = vadd.f32 %v599_v19, %v421_v12  ;;  %v601_v23 = vpop.f32.mrb[14].mxu0 }
 0x129   : > { %v690_v24 = vmul.f32 0.2, %v598_v18  ;;  %v602_v25 = vadd.f32 %v601_v23, %v426_v21  ;;  %v603_v26 = vpop.f32.mrb[15].mxu0  ;;  %922 = vmatprep.subr.bf16.mxu1 %v779_v20  ;;  %vm658_vm13 = vcmp.ge.f32.partialorder %v598_v18, 0.0 }
 0x12a   : > { %v691_v27 = vmul.f32 0.2, %v600_v22  ;;  %v604_v28 = vadd.f32 %v603_v26, %v426_v21  ;;  %923 = vmatpush1.bf16.msra.mxu1 %v778_v16  ;;  %vm659_vm14 = vcmp.ge.f32.partialorder %v600_v22, 0.0 }
 0x12b   : > { %vm660_vm15 = vcmp.ge.f32.partialorder %v602_v25, 0.0  ;;  %v692_v29 = vmul.f32 0.2, %v602_v25  ;;  %v722_v31 = vsel %vm658_vm13, %v598_v18, %v690_v24  ;;  %v456_v18 = vpop.permute.xlu1 %455 }
 0x12c   : > { %vm661_vm0 = vcmp.ge.f32.partialorder %v604_v28, 0.0  ;;  %v693_v30 = vmul.f32 0.2, %v604_v28  ;;  %v723_v35 = vsel %vm659_vm14, %v600_v22, %v691_v27 }
 0x12d   : > { %v724_v32 = vsel %vm660_vm15, %v602_v25, %v692_v29 }
 0x12e   : > { %v607_v34 = vpop.f32.mrb[16].mxu0  ;;  %v725_v36 = vsel %vm661_vm0, %v604_v28, %v693_v30  ;;  %v780_v37 = vpack.c.bf16 %v724_v32, %v722_v31  ;;  %v461_v30 = vpop.permute.xlu0 %460 }
 0x12f   : > { %v608_v38 = vadd.f32 %v607_v34, %v431_v33  ;;  %v609_v39 = vpop.f32.mrb[17].mxu0  ;;  %v781_v40 = vpack.c.bf16 %v725_v36, %v723_v35 }
 0x130   : > { %v610_v42 = vadd.f32 %v609_v39, %v431_v33  ;;  %v611_v43 = vpop.f32.mrb[18].mxu0 }
 0x131   : > { %v694_v44 = vmul.f32 0.2, %v608_v38  ;;  %v612_v45 = vadd.f32 %v611_v43, %v436_v41  ;;  %v613_v46 = vpop.f32.mrb[19].mxu0  ;;  %924 = vmatprep.subr.bf16.mxu1 %v781_v40  ;;  %vm662_vm1 = vcmp.ge.f32.partialorder %v608_v38, 0.0 }
 0x132   : > { %v695_v47 = vmul.f32 0.2, %v610_v42  ;;  %v614_v48 = vadd.f32 %v613_v46, %v436_v41  ;;  %925 = vmatpush1.bf16.msra.mxu1 %v780_v37  ;;  %vm663_vm2 = vcmp.ge.f32.partialorder %v610_v42, 0.0 }
 0x133   : > { %vm664_vm3 = vcmp.ge.f32.partialorder %v612_v45, 0.0  ;;  %v696_v49 = vmul.f32 0.2, %v612_v45  ;;  %v726_v51 = vsel %vm662_vm1, %v608_v38, %v694_v44  ;;  %v466_v38 = vpop.permute.xlu1 %465 }
 0x134   : > { %vm665_vm4 = vcmp.ge.f32.partialorder %v614_v48, 0.0  ;;  %v697_v50 = vmul.f32 0.2, %v614_v48  ;;  %v727_v55 = vsel %vm663_vm2, %v610_v42, %v695_v47 }
 0x135   : > { %v728_v52 = vsel %vm664_vm3, %v612_v45, %v696_v49 }
 0x136   : > { %v617_v54 = vpop.f32.mrb[20].mxu0  ;;  %v729_v56 = vsel %vm665_vm4, %v614_v48, %v697_v50  ;;  %v782_v57 = vpack.c.bf16 %v728_v52, %v726_v51 }
 0x137   : > { %v618_v58 = vadd.f32 %v617_v54, %v441_v53  ;;  %v619_v59 = vpop.f32.mrb[21].mxu0  ;;  %v783_v60 = vpack.c.bf16 %v729_v56, %v727_v55  ;;  %v1399_v54 = vld [vmem:[%s1830_s3] sm:$0xff]   ;;  %v1400_v55 = vld [vmem:[%s1830_s3 + $0x8] sm:$0xff]   ;;  %v1401_v56 = vld [vmem:[%s1830_s3 + $0x10] sm:$0xff]  }
 0x138   : > { %v620_v62 = vadd.f32 %v619_v59, %v441_v53  ;;  %v621_v63 = vpop.f32.mrb[22].mxu0  ;;  %v1404_v59 = vld [vmem:[%s1830_s3 + $0x28] sm:$0xff]  }
 0x139   : > { %v698_v0 = vmul.f32 0.2, %v618_v58  ;;  %v622_v1 = vadd.f32 %v621_v63, %v446_v61  ;;  %v623_v2 = vpop.f32.mrb[23].mxu0  ;;  %926 = vmatprep.subr.bf16.mxu1 %v783_v60  ;;  %vm666_vm5 = vcmp.ge.f32.partialorder %v618_v58, 0.0  ;;  %v1405_v60 = vld [vmem:[%s1830_s3 + $0x30] sm:$0xff]  }
 0x13a   : > { %v699_v3 = vmul.f32 0.2, %v620_v62  ;;  %v624_v4 = vadd.f32 %v623_v2, %v446_v61  ;;  %927 = vmatpush1.bf16.msra.mxu1 %v782_v57  ;;  %vm667_vm6 = vcmp.ge.f32.partialorder %v620_v62, 0.0  ;;  %v1402_v57 = vld [vmem:[%s1830_s3 + $0x18] sm:$0xff]   ;;  %v798_v2 = vpop.permute.xlu1 %797 }
 0x13b   : > { %vm668_vm7 = vcmp.ge.f32.partialorder %v622_v1, 0.0  ;;  %v700_v5 = vmul.f32 0.2, %v622_v1  ;;  %v730_v7 = vsel %vm666_vm5, %v618_v58, %v698_v0  ;;  %v1403_v58 = vld [vmem:[%s1830_s3 + $0x20] sm:$0xff]   ;;  %v1406_v61 = vld [vmem:[%s1830_s3 + $0x38] sm:$0xff]  }
 0x13c   : > { %vm669_vm8 = vcmp.ge.f32.partialorder %v624_v4, 0.0  ;;  %v701_v6 = vmul.f32 0.2, %v624_v4  ;;  %v731_v11 = vsel %vm667_vm6, %v620_v62, %v699_v3  ;;  %v793_v62 = vpop.permute.xlu0 %792 }
 0x13d   : > { %v732_v8 = vsel %vm668_vm7, %v622_v1, %v700_v5 }
 0x13e   : > { %v627_v10 = vpop.f32.mrb[24].mxu0  ;;  %v733_v12 = vsel %vm669_vm8, %v624_v4, %v701_v6  ;;  %v784_v13 = vpack.c.bf16 %v732_v8, %v730_v7 }
 0x13f   : > { %v628_v14 = vadd.f32 %v627_v10, %v451_v9  ;;  %v629_v15 = vpop.f32.mrb[25].mxu0  ;;  %v785_v16 = vpack.c.bf16 %v733_v12, %v731_v11 }
 0x140   : > { %v630_v19 = vadd.f32 %v629_v15, %v451_v9  ;;  %v631_v20 = vpop.f32.mrb[26].mxu0 }
 0x141   : > { %v702_v21 = vmul.f32 0.2, %v628_v14  ;;  %v632_v22 = vadd.f32 %v631_v20, %v456_v18  ;;  %v633_v23 = vpop.f32.mrb[27].mxu0  ;;  %928 = vmatprep.subr.bf16.mxu1 %v785_v16  ;;  %vm670_vm9 = vcmp.ge.f32.partialorder %v628_v14, 0.0 }
 0x142   : > { %v703_v24 = vmul.f32 0.2, %v630_v19  ;;  %v634_v25 = vadd.f32 %v633_v23, %v456_v18  ;;  %929 = vmatpush1.bf16.msra.mxu1 %v784_v13  ;;  %vm671_vm10 = vcmp.ge.f32.partialorder %v630_v19, 0.0  ;;  %v803_v13 = vpop.permute.xlu0 %802 }
 0x143   : > { %vm672_vm11 = vcmp.ge.f32.partialorder %v632_v22, 0.0  ;;  %v704_v26 = vmul.f32 0.2, %v632_v22  ;;  %v734_v28 = vsel %vm670_vm9, %v628_v14, %v702_v21 }
 0x144   : > { %vm673_vm12 = vcmp.ge.f32.partialorder %v634_v25, 0.0  ;;  %v705_v27 = vmul.f32 0.2, %v634_v25  ;;  %v735_v32 = vsel %vm671_vm10, %v630_v19, %v703_v24 }
 0x145   : > { %v736_v29 = vsel %vm672_vm11, %v632_v22, %v704_v26  ;;  %v808_v22 = vpop.permute.xlu1 %807 }
 0x146   : > { %v637_v31 = vpop.f32.mrb[28].mxu0  ;;  %v737_v33 = vsel %vm673_vm12, %v634_v25, %v705_v27  ;;  %v786_v34 = vpack.c.bf16 %v736_v29, %v734_v28 }
 0x147   : > { %v638_v35 = vadd.f32 %v637_v31, %v461_v30  ;;  %v639_v36 = vpop.f32.mrb[29].mxu0  ;;  %v787_v37 = vpack.c.bf16 %v737_v33, %v735_v32 }
 0x148   : > { %v640_v39 = vadd.f32 %v639_v36, %v461_v30  ;;  %v641_v40 = vpop.f32.mrb[30].mxu0 }
 0x149   : > { %v706_v41 = vmul.f32 0.2, %v638_v35  ;;  %v642_v42 = vadd.f32 %v641_v40, %v466_v38  ;;  %v643_v43 = vpop.f32.mrb[31].mxu0  ;;  %930 = vmatprep.subr.bf16.mxu1 %v787_v37  ;;  %vm674_vm13 = vcmp.ge.f32.partialorder %v638_v35, 0.0 }
 0x14a   : > { %v707_v44 = vmul.f32 0.2, %v640_v39  ;;  %v644_v45 = vadd.f32 %v643_v43, %v466_v38  ;;  %931 = vmatpush1.bf16.msra.mxu1 %v786_v34  ;;  %vm675_vm14 = vcmp.ge.f32.partialorder %v640_v39, 0.0  ;;  %v813_v34 = vpop.permute.xlu0 %812 }
 0x14b   : > { %vm676_vm15 = vcmp.ge.f32.partialorder %v642_v42, 0.0  ;;  %v708_v46 = vmul.f32 0.2, %v642_v42  ;;  %v738_v48 = vsel %vm674_vm13, %v638_v35, %v706_v41 }
 0x14c   : > { %vm677_vm0 = vcmp.ge.f32.partialorder %v644_v45, 0.0  ;;  %v709_v47 = vmul.f32 0.2, %v644_v45  ;;  %v739_v50 = vsel %vm675_vm14, %v640_v39, %v707_v44 }
 0x14d   : > { %v740_v49 = vsel %vm676_vm15, %v642_v42, %v708_v46  ;;  %v818_v42 = vpop.permute.xlu1 %817 }
 0x14e   : > { %v741_v51 = vsel %vm677_vm0, %v644_v45, %v709_v47  ;;  %v788_v52 = vpack.c.bf16 %v740_v49, %v738_v48 }
 0x14f   : > { %v789_v53 = vpack.c.bf16 %v741_v51, %v739_v50 }
 0x151   : > { %932 = vmatprep.subr.bf16.mxu1 %v789_v53 }
 0x152   : > { %933 = vmatpush1.bf16.msra.mxu1 %v788_v52 }
 0x155   : > { %951 = vmatmul.mubr.bf16.vlgmr.msra.gmra.mrb[0].mxu1 %v1399_v54  ;;  %v823_v54 = vpop.permute.xlu0 %822 }
 0x156   : > { %960 = vmatprep.mubr.bf16.mxu1 %v1479_v17 }
 0x15d   : > { %961 = vmatmul.mubr.bf16.gmra.mrb[4].mxu1 %v1400_v55 }
 0x15e   : > { %970 = vmatprep.mubr.bf16.mxu1 %v1479_v17 }
 0x165   : > { %971 = vmatmul.mubr.bf16.gmra.mrb[8].mxu1 %v1401_v56 }
 0x166   : > { %980 = vmatprep.mubr.bf16.mxu1 %v1479_v17 }
 0x16d   : > { %981 = vmatmul.mubr.bf16.gmra.mrb[12].mxu1 %v1402_v57 }
 0x16e   : > { %990 = vmatprep.mubr.bf16.mxu1 %v1479_v17 }
 0x175   : > { %991 = vmatmul.mubr.bf16.gmra.mrb[16].mxu1 %v1403_v58 }
 0x176   : > { %1000 = vmatprep.mubr.bf16.mxu1 %v1479_v17 }
 0x17d   : > { %1001 = vmatmul.mubr.bf16.gmra.mrb[20].mxu1 %v1404_v59 }
 0x17e   : > { %1010 = vmatprep.mubr.bf16.mxu1 %v1479_v17 }
 0x185   : > { %1011 = vmatmul.mubr.bf16.gmra.mrb[24].mxu1 %v1405_v60 }
 0x186   : > { %1020 = vmatprep.mubr.bf16.mxu1 %v1479_v17 }
 0x18d   : > { %1021 = vmatmul.mubr.bf16.gmra.mrb[28].mxu1 %v1406_v61 }
 0x228   : > { %v952_v63 = vpop.f32.mrb[0].mxu1 }
 0x229   : > { %v953_v0 = vadd.f32 %v952_v63, %v793_v62  ;;  %v954_v1 = vpop.f32.mrb[1].mxu1 }
 0x22a   : > { %v955_v3 = vadd.f32 %v954_v1, %v793_v62  ;;  %v956_v4 = vpop.f32.mrb[2].mxu1  ;;  %v828_v62 = vpop.permute.xlu1 %827 }
 0x22b   : > { %v1063_v5 = vmul.f32 0.2, %v953_v0  ;;  %v957_v6 = vadd.f32 %v956_v4, %v798_v2  ;;  %v958_v7 = vpop.f32.mrb[3].mxu1  ;;  %vm1031_vm1 = vcmp.ge.f32.partialorder %v953_v0, 0.0 }
 0x22c   : > { %v1064_v8 = vmul.f32 0.2, %v955_v3  ;;  %v959_v9 = vadd.f32 %v958_v7, %v798_v2  ;;  %vm1032_vm2 = vcmp.ge.f32.partialorder %v955_v3, 0.0 }
 0x22d   : > { %vm1033_vm3 = vcmp.ge.f32.partialorder %v957_v6, 0.0  ;;  %v1065_v17 = vmul.f32 0.2, %v957_v6  ;;  %v1095_v11 = vsel %vm1031_vm1, %v953_v0, %v1063_v5 }
 0x22e   : > { %vm1034_vm4 = vcmp.ge.f32.partialorder %v959_v9, 0.0  ;;  %v1066_v10 = vmul.f32 0.2, %v959_v9  ;;  %v1096_v16 = vsel %vm1032_vm2, %v955_v3, %v1064_v8 }
 0x22f   : > { %v1097_v12 = vsel %vm1033_vm3, %v957_v6, %v1065_v17  ;;  %v833_v17 = vpop.permute.xlu0 %832 }
 0x230   : > { %v1129_v14 = vpack.c.bf16 %v1097_v12, %v1095_v11  ;;  %v962_v15 = vpop.f32.mrb[4].mxu1  ;;  %v1098_v18 = vsel %vm1034_vm4, %v959_v9, %v1066_v10 }
 0x231   : > { %v963_v19 = vadd.f32 %v962_v15, %v803_v13  ;;  %v964_v20 = vpop.f32.mrb[5].mxu1  ;;  %v1130_v21 = vpack.c.bf16 %v1098_v18, %v1096_v16  ;;  %v838_v18 = vpop.permute.xlu1 %837 }
 0x232   : > { %v965_v23 = vadd.f32 %v964_v20, %v803_v13  ;;  %v966_v24 = vpop.f32.mrb[6].mxu1 }
 0x233   : > { %v1067_v25 = vmul.f32 0.2, %v963_v19  ;;  %v967_v26 = vadd.f32 %v966_v24, %v808_v22  ;;  %v968_v27 = vpop.f32.mrb[7].mxu1  ;;  %1154 = vmatprep.subr.bf16.mxu0 %v1130_v21  ;;  %vm1035_vm5 = vcmp.ge.f32.partialorder %v963_v19, 0.0 }
 0x234   : > { %v1068_v28 = vmul.f32 0.2, %v965_v23  ;;  %v969_v29 = vadd.f32 %v968_v27, %v808_v22  ;;  %1155 = vmatpush1.bf16.msra.mxu0 %v1129_v14  ;;  %vm1036_vm6 = vcmp.ge.f32.partialorder %v965_v23, 0.0 }
 0x235   : > { %vm1037_vm7 = vcmp.ge.f32.partialorder %v967_v26, 0.0  ;;  %v1069_v30 = vmul.f32 0.2, %v967_v26  ;;  %v1099_v32 = vsel %vm1035_vm5, %v963_v19, %v1067_v25 }
 0x236   : > { %vm1038_vm8 = vcmp.ge.f32.partialorder %v969_v29, 0.0  ;;  %v1070_v31 = vmul.f32 0.2, %v969_v29  ;;  %v1100_v37 = vsel %vm1036_vm6, %v965_v23, %v1068_v28 }
 0x237   : > { %v1101_v33 = vsel %vm1037_vm7, %v967_v26, %v1069_v30  ;;  %v843_v30 = vpop.permute.xlu0 %842 }
 0x238   : > { %v1131_v35 = vpack.c.bf16 %v1101_v33, %v1099_v32  ;;  %v972_v36 = vpop.f32.mrb[8].mxu1  ;;  %v1102_v38 = vsel %vm1038_vm8, %v969_v29, %v1070_v31 }
 0x239   : > { %v973_v39 = vadd.f32 %v972_v36, %v813_v34  ;;  %v974_v40 = vpop.f32.mrb[9].mxu1  ;;  %v1132_v41 = vpack.c.bf16 %v1102_v38, %v1100_v37  ;;  %v848_v38 = vpop.permute.xlu1 %847 }
 0x23a   : > { %v975_v43 = vadd.f32 %v974_v40, %v813_v34  ;;  %v976_v44 = vpop.f32.mrb[10].mxu1 }
 0x23b   : > { %v1071_v45 = vmul.f32 0.2, %v973_v39  ;;  %v977_v46 = vadd.f32 %v976_v44, %v818_v42  ;;  %v978_v47 = vpop.f32.mrb[11].mxu1  ;;  %1156 = vmatprep.subr.bf16.mxu0 %v1132_v41  ;;  %vm1039_vm9 = vcmp.ge.f32.partialorder %v973_v39, 0.0 }
 0x23c   : > { %v1072_v48 = vmul.f32 0.2, %v975_v43  ;;  %v979_v49 = vadd.f32 %v978_v47, %v818_v42  ;;  %1157 = vmatpush1.bf16.msra.mxu0 %v1131_v35  ;;  %vm1040_vm10 = vcmp.ge.f32.partialorder %v975_v43, 0.0 }
 0x23d   : > { %vm1041_vm11 = vcmp.ge.f32.partialorder %v977_v46, 0.0  ;;  %v1073_v50 = vmul.f32 0.2, %v977_v46  ;;  %v1103_v52 = vsel %vm1039_vm9, %v973_v39, %v1071_v45 }
 0x23e   : > { %vm1042_vm12 = vcmp.ge.f32.partialorder %v979_v49, 0.0  ;;  %v1074_v51 = vmul.f32 0.2, %v979_v49  ;;  %v1104_v57 = vsel %vm1040_vm10, %v975_v43, %v1072_v48 }
 0x23f   : > { %v1105_v53 = vsel %vm1041_vm11, %v977_v46, %v1073_v50  ;;  %v853_v50 = vpop.permute.xlu0 %852 }
 0x240   : > { %v1133_v55 = vpack.c.bf16 %v1105_v53, %v1103_v52  ;;  %v982_v56 = vpop.f32.mrb[12].mxu1  ;;  %v1106_v58 = vsel %vm1042_vm12, %v979_v49, %v1074_v51 }
 0x241   : > { %v983_v59 = vadd.f32 %v982_v56, %v823_v54  ;;  %v984_v60 = vpop.f32.mrb[13].mxu1  ;;  %v1134_v61 = vpack.c.bf16 %v1106_v58, %v1104_v57  ;;  %v858_v58 = vpop.permute.xlu1 %857 }
 0x242   : > { %v985_v63 = vadd.f32 %v984_v60, %v823_v54  ;;  %v986_v0 = vpop.f32.mrb[14].mxu1 }
 0x243   : > { %v1075_v1 = vmul.f32 0.2, %v983_v59  ;;  %v987_v2 = vadd.f32 %v986_v0, %v828_v62  ;;  %v988_v3 = vpop.f32.mrb[15].mxu1  ;;  %1158 = vmatprep.subr.bf16.mxu0 %v1134_v61  ;;  %vm1043_vm13 = vcmp.ge.f32.partialorder %v983_v59, 0.0 }
 0x244   : > { %v1076_v4 = vmul.f32 0.2, %v985_v63  ;;  %v989_v5 = vadd.f32 %v988_v3, %v828_v62  ;;  %1159 = vmatpush1.bf16.msra.mxu0 %v1133_v55  ;;  %vm1044_vm14 = vcmp.ge.f32.partialorder %v985_v63, 0.0 }
 0x245   : > { %vm1045_vm15 = vcmp.ge.f32.partialorder %v987_v2, 0.0  ;;  %v1077_v6 = vmul.f32 0.2, %v987_v2  ;;  %v1107_v8 = vsel %vm1043_vm13, %v983_v59, %v1075_v1 }
 0x246   : > { %vm1046_vm0 = vcmp.ge.f32.partialorder %v989_v5, 0.0  ;;  %v1078_v7 = vmul.f32 0.2, %v989_v5  ;;  %v1108_v12 = vsel %vm1044_vm14, %v985_v63, %v1076_v4 }
 0x247   : > { %v1109_v9 = vsel %vm1045_vm15, %v987_v2, %v1077_v6  ;;  %v863_v6 = vpop.permute.xlu0 %862 }
 0x248   : > { %v1135_v10 = vpack.c.bf16 %v1109_v9, %v1107_v8  ;;  %v992_v11 = vpop.f32.mrb[16].mxu1  ;;  %v1110_v13 = vsel %vm1046_vm0, %v989_v5, %v1078_v7 }
 0x249   : > { %v993_v14 = vadd.f32 %v992_v11, %v833_v17  ;;  %v994_v15 = vpop.f32.mrb[17].mxu1  ;;  %v1136_v16 = vpack.c.bf16 %v1110_v13, %v1108_v12  ;;  %v868_v13 = vpop.permute.xlu1 %867 }
 0x24a   : > { %v995_v19 = vadd.f32 %v994_v15, %v833_v17  ;;  %v996_v20 = vpop.f32.mrb[18].mxu1 }
 0x24b   : > { %v1079_v21 = vmul.f32 0.2, %v993_v14  ;;  %v997_v22 = vadd.f32 %v996_v20, %v838_v18  ;;  %v998_v23 = vpop.f32.mrb[19].mxu1  ;;  %1160 = vmatprep.subr.bf16.mxu0 %v1136_v16  ;;  %vm1047_vm1 = vcmp.ge.f32.partialorder %v993_v14, 0.0 }
 0x24c   : > { %v1080_v24 = vmul.f32 0.2, %v995_v19  ;;  %v999_v25 = vadd.f32 %v998_v23, %v838_v18  ;;  %1161 = vmatpush1.bf16.msra.mxu0 %v1135_v10  ;;  %vm1048_vm2 = vcmp.ge.f32.partialorder %v995_v19, 0.0 }
 0x24d   : > { %vm1049_vm3 = vcmp.ge.f32.partialorder %v997_v22, 0.0  ;;  %v1081_v26 = vmul.f32 0.2, %v997_v22  ;;  %v1111_v28 = vsel %vm1047_vm1, %v993_v14, %v1079_v21 }
 0x24e   : > { %vm1050_vm4 = vcmp.ge.f32.partialorder %v999_v25, 0.0  ;;  %v1082_v27 = vmul.f32 0.2, %v999_v25  ;;  %v1112_v33 = vsel %vm1048_vm2, %v995_v19, %v1080_v24 }
 0x24f   : > { %v1113_v29 = vsel %vm1049_vm3, %v997_v22, %v1081_v26 }
 0x250   : > { %v1137_v31 = vpack.c.bf16 %v1113_v29, %v1111_v28  ;;  %v1002_v32 = vpop.f32.mrb[20].mxu1  ;;  %v1114_v34 = vsel %vm1050_vm4, %v999_v25, %v1082_v27 }
 0x251   : > { %v1003_v35 = vadd.f32 %v1002_v32, %v843_v30  ;;  %v1004_v36 = vpop.f32.mrb[21].mxu1  ;;  %v1138_v37 = vpack.c.bf16 %v1114_v34, %v1112_v33  ;;  %v1148_v34 = vpop.permute.xlu0 %1147 }
 0x252   : > { %v1005_v39 = vadd.f32 %v1004_v36, %v843_v30  ;;  %v1006_v40 = vpop.f32.mrb[22].mxu1  ;;  %v1127_v30 = vld [vmem:[%s1832_s5] sm:$0x1] }
 0x253   : > { %v1083_v41 = vmul.f32 0.2, %v1003_v35  ;;  %v1007_v42 = vadd.f32 %v1006_v40, %v848_v38  ;;  %v1008_v43 = vpop.f32.mrb[23].mxu1  ;;  %1162 = vmatprep.subr.bf16.mxu0 %v1138_v37  ;;  %vm1051_vm5 = vcmp.ge.f32.partialorder %v1003_v35, 0.0 }
 0x254   : > { %v1084_v44 = vmul.f32 0.2, %v1005_v39  ;;  %v1009_v45 = vadd.f32 %v1008_v43, %v848_v38  ;;  %1163 = vmatpush1.bf16.msra.mxu0 %v1137_v31  ;;  %vm1052_vm6 = vcmp.ge.f32.partialorder %v1005_v39, 0.0  ;;  %v1150_v31 = vlaneseq }
 0x255   : > { %vm1053_vm7 = vcmp.ge.f32.partialorder %v1007_v42, 0.0  ;;  %v1085_v46 = vmul.f32 0.2, %v1007_v42  ;;  %v1115_v48 = vsel %vm1051_vm5, %v1003_v35, %v1083_v41 }
 0x256   : > { %vm1054_vm8 = vcmp.ge.f32.partialorder %v1009_v45, 0.0  ;;  %v1086_v47 = vmul.f32 0.2, %v1009_v45  ;;  %v1116_v53 = vsel %vm1052_vm6, %v1005_v39, %v1084_v44  ;;  %v1151_v32 = vshrl.u32 %v1150_v31, 7 }
 0x257   : > { %v1117_v49 = vsel %vm1053_vm7, %v1007_v42, %v1085_v46  ;;  %vm1225_vm1 = vcmp.lt.s32.totalorder %v1150_v31, 256 }
 0x258   : > { %v1139_v51 = vpack.c.bf16 %v1117_v49, %v1115_v48  ;;  %v1012_v52 = vpop.f32.mrb[24].mxu1  ;;  %v1118_v54 = vsel %vm1054_vm8, %v1009_v45, %v1086_v47  ;;  %v1152_v33 = vsub.s32 0, %v1151_v32 }
 0x259   : > { %v1013_v55 = vadd.f32 %v1012_v52, %v853_v50  ;;  %v1014_v56 = vpop.f32.mrb[25].mxu1  ;;  %v1140_v57 = vpack.c.bf16 %v1118_v54, %v1116_v53 }
 0x25a   : > { %v1015_v59 = vadd.f32 %v1014_v56, %v853_v50  ;;  %v1016_v60 = vpop.f32.mrb[26].mxu1  ;;  %v1153_v35 = vrot.slane %v1148_v34, %v1152_v33  ;;  %v1480_v50 = vmov 1966171168  }
 0x25b   : > { %v1087_v61 = vmul.f32 0.2, %v1013_v55  ;;  %v1017_v62 = vadd.f32 %v1016_v60, %v858_v58  ;;  %v1018_v63 = vpop.f32.mrb[27].mxu1  ;;  %1164 = vmatprep.subr.bf16.mxu0 %v1140_v57  ;;  %vm1055_vm9 = vcmp.ge.f32.partialorder %v1013_v55, 0.0 }
 0x25c   : > { %v1088_v0 = vmul.f32 0.2, %v1015_v59  ;;  %v1019_v1 = vadd.f32 %v1018_v63, %v858_v58  ;;  %1165 = vmatpush1.bf16.msra.mxu0 %v1139_v51  ;;  %vm1056_vm10 = vcmp.ge.f32.partialorder %v1015_v59, 0.0  ;;  %v1209_v51 = vunpack.c.l.s4 %v1480_v50 }
 0x25d   : > { %vm1057_vm11 = vcmp.ge.f32.partialorder %v1017_v62, 0.0  ;;  %v1089_v2 = vmul.f32 0.2, %v1017_v62  ;;  %v1119_v4 = vsel %vm1055_vm9, %v1013_v55, %v1087_v61 }
 0x25e   : > { %vm1058_vm12 = vcmp.ge.f32.partialorder %v1019_v1, 0.0  ;;  %v1090_v3 = vmul.f32 0.2, %v1019_v1  ;;  %v1120_v9 = vsel %vm1056_vm10, %v1015_v59, %v1088_v0  ;;  %v1210_v52 = vunpack.c.0.s8 %v1209_v51 }
 0x25f   : > { %v1121_v5 = vsel %vm1057_vm11, %v1017_v62, %v1089_v2 }
 0x260   : > { %v1141_v7 = vpack.c.bf16 %v1121_v5, %v1119_v4  ;;  %v1022_v8 = vpop.f32.mrb[28].mxu1  ;;  %v1122_v17 = vsel %vm1058_vm12, %v1019_v1, %v1090_v3  ;;  %v1213_v54 = vsub.s32 %v1210_v52, %v1151_v32 }
 0x261   : > { %v1023_v10 = vadd.f32 %v1022_v8, %v863_v6  ;;  %v1024_v11 = vpop.f32.mrb[29].mxu1  ;;  %v1142_v12 = vpack.c.bf16 %v1122_v17, %v1120_v9 }
 0x262   : > { %v1025_v14 = vadd.f32 %v1024_v11, %v863_v6  ;;  %v1026_v15 = vpop.f32.mrb[30].mxu1 }
 0x263   : > { %v1091_v16 = vmul.f32 0.2, %v1023_v10  ;;  %v1027_v18 = vadd.f32 %v1026_v15, %v868_v13  ;;  %v1028_v19 = vpop.f32.mrb[31].mxu1  ;;  %1166 = vmatprep.subr.bf16.mxu0 %v1142_v12  ;;  %vm1059_vm13 = vcmp.ge.f32.partialorder %v1023_v10, 0.0 }
 0x264   : > { %v1092_v20 = vmul.f32 0.2, %v1025_v14  ;;  %v1029_v21 = vadd.f32 %v1028_v19, %v868_v13  ;;  %1167 = vmatpush1.bf16.msra.mxu0 %v1141_v7  ;;  %vm1060_vm14 = vcmp.ge.f32.partialorder %v1025_v14, 0.0 }
 0x265   : > { %vm1061_vm15 = vcmp.ge.f32.partialorder %v1027_v18, 0.0  ;;  %v1093_v22 = vmul.f32 0.2, %v1027_v18  ;;  %v1123_v24 = vsel %vm1059_vm13, %v1023_v10, %v1091_v16 }
 0x266   : > { %vm1062_vm0 = vcmp.ge.f32.partialorder %v1029_v21, 0.0  ;;  %v1094_v23 = vmul.f32 0.2, %v1029_v21  ;;  %v1124_v27 = vsel %vm1060_vm14, %v1025_v14, %v1092_v20 }
 0x267   : > { %v1125_v25 = vsel %vm1061_vm15, %v1027_v18, %v1093_v22 }
 0x268   : > { %v1143_v26 = vpack.c.bf16 %v1125_v25, %v1123_v24  ;;  %v1126_v28 = vsel %vm1062_vm0, %v1029_v21, %v1094_v23 }
 0x269   : > { %v1144_v29 = vpack.c.bf16 %v1126_v28, %v1124_v27 }
 0x26b   : > { %1168 = vmatprep.subr.bf16.mxu0 %v1144_v29 }
 0x26c   : > { %1169 = vmatpush1.bf16.msra.mxu0 %v1143_v26 }
 0x26f   : > { %1187 = vmatmul.mubr.bf16.vlgmr.msra.gmra.mrb[32].mxu0 %v1127_v30 }
 0x342   : > { %v1188_v36 = vpop.f32.mrb[32].mxu0 }
 0x343   : > { %v1189_v37 = vadd.f32 %v1188_v36, %v1153_v35  ;;  %v1190_v38 = vpop.f32.mrb[33].mxu0 }
 0x344   : > { %v1191_v39 = vadd.f32 %v1190_v38, %v1153_v35  ;;  %v1192_v40 = vpop.f32.mrb[34].mxu0 }
 0x345   : > { %v1195_v41 = vsub.f32 0.0, %v1189_v37  ;;  %v1193_v42 = vpop.f32.mrb[35].mxu0 }
 0x346   : > { %v1196_v43 = vsub.f32 0.0, %v1191_v39 }
 0x347   : > { %v1197_v44 = vmul.f32 1.442695, %v1195_v41 }
 0x348   : > { %v1199_v45 = vmul.f32 1.442695, %v1196_v43 }
 0x349   : > { %1407 = vpow2.f32 %v1197_v44 }
 0x34a   : > { %1409 = vpow2.f32 %v1199_v45 }
 0x353   : > { %v1408_v46 = vpop.eup %1407 }
 0x354   : > { %v1410_v47 = vpop.eup %1409  ;;  %v1201_v48 = vadd.f32 1.0, %v1408_v46 }
 0x355   : > { %v1202_v49 = vadd.f32 1.0, %v1410_v47 }
 0x356   : > { %1411 = vrcp.f32 %v1201_v48 }
 0x357   : > { %1413 = vrcp.f32 %v1202_v49 }
 0x360   : > { %v1412_v53 = vpop.eup %1411 }
 0x361   : > { %v1414_v55 = vpop.eup %1413 }
 0x362   : > { %v1207_v56 = vcombine.low %v1412_v53, %v1414_v55 }
 0x364   : > { %v1214_v57 = vrot.slane %v1207_v56, %v1213_v54 }
 0x366   : > { %v1221_v58 = vrot.slane %v1214_v57, %v1213_v54 }
 0x368   : > { %1227 = vst.msk [vmem:[%s328_s30] sm:$0x3] %vm1225_vm1, %v1221_v58 }
 0x369   : > { %1428 = shalt.err (!%p1425_p5)
}
 0x36a   : > { %s1429_s21 = scalar_lea.hbm %s1783_s15, 32  ;;  %s1433_s23 = scalar_lea.hbm %s1834_s7, 64 }
 0x36b   : > { %p1430_p7 = scmp.ne.s32.totalorder %s1783_s15, %s1429_s21  ;;  %p1434_p12 = scmp.lt.u32.totalorder %s1783_s15, %s1834_s7 }
 0x36c   : > { %p1435_p13 = scmp.lt.u32.totalorder %s1433_s23, %s1429_s21  ;;  %p1437_p1 = scmp.lt.u32.totalorder %s1429_s21, %s1783_s15 }
 0x36d   : > { %p1431_p10 = pnand %p1430_p7, %p1563_p6 }
 0x36e   : > { %p1436_p0 = por %p1435_p13, %p1434_p12 }
 0x36f   : > { %p1432_p11 = pneg %p1431_p10 }
 0x370   : > { %p1438_p2 = por %p1437_p1, %p1436_p0 }
 0x372   : > { %p1439_p3 = pnand %p1438_p2, %p1432_p11 }
 0x374   : > { %1442 = shalt.err (!%p1439_p3)
}
 0x375   : > { %1348 = dma.vmem_to_hbm [thread:$0]  (%p1563_p6), %s1785_s9, 32, %s1783_s15, %s1229_s16  }
 0x376 PF: > { %s1255_s30 = sand.u32 1, %s1465_s26   ;;  %p1351_p4 = pnand %p1310_p9, %p1567_p8 }
 0x377   : > { %s1256_s10 = scalar_lea.sflag [#allocation5], %s1255_s30 }
 0x378   : > { %1460 = dma.done.wait (!%p1351_p4), %s1256_s10, 32  }
 0x379   : > { %1462 = vsyncadd (!%p1351_p4), %s1256_s10, 4294967264  ;;  %p19_p5 = scmp.ge.s32.totalorder %s1548_s8, 4   ;;  %s1837_s26 = smov %s1469_s27 }
 0x37a   : > { %s1838_s27 = smov %s1473_s28  ;;  %s1839_s28 = smov %s1561_s11 }
 0x37b   : > { %s1840_s29 = smov %s1548_s8  ;;  %21 = sbr.rel (!%p19_p5) target bundleno = 6 (0x6), region = 111 }
 0x382   :  { %1261 = vsyncpa [#allocation5], 1 }
 0x383   :  { %1263 = vsyncpa [#allocation5 + $0x1], 1 }

</bundles_post_ra>
